<compile_context>
chip_gen: v7x
topology: tpu7x:2x2x1
jax: 0.10.0
libtpu: 0.0.40
codegen_flags: <defaults>
</compile_context>

<pallas_src>
import numpy as np
import jax
import jax.numpy as jnp
from jax.experimental import pallas as pl
from jax.experimental.pallas import tpu as pltpu

# ---- model dimensions (from AttGNN.__init__) --------------------------------
F_IN = 20      # num_features_pro
F_OUT = 20     # GATConv output dim (heads=1)
N_OUT = 5      # n_output

# ---- packed-parameter slab layout (rows 8-aligned for cheap sublane slices) --
ROW_W = 0              # rows [0, 20)   : W            [F_IN, F_OUT]
ROW_ATT = 24           # rows [24, 44)  : att_T        [F_OUT, 2] (col0=src, col1=dst)
ROW_B = 48             # row 48         : GAT bias     [1, F_OUT]
ROW_OW = 56            # rows [56, 76)  : out weight   [F_OUT, N_OUT]
ROW_OB = 80            # row 80         : out bias     [1, N_OUT]
P_ROWS = 88
P_COLS = F_OUT


def attgnn_kernel(params_ref, x_ref, adj_ref, pool_ref, out_ref):
    # One parameter slab DMA instead of six small ones (static 8-aligned slices).
    P = params_ref[...]                                         # [P_ROWS, P_COLS]
    w = P[ROW_W:ROW_W + F_IN, 0:F_OUT]                          # [F_IN, F_OUT]
    att_t = P[ROW_ATT:ROW_ATT + F_OUT, 0:2]                     # [F_OUT, 2]
    bias = P[ROW_B:ROW_B + 1, 0:F_OUT]                          # [1, F_OUT]
    ow = P[ROW_OW:ROW_OW + F_OUT, 0:N_OUT]                      # [F_OUT, N_OUT]
    ob = P[ROW_OB:ROW_OB + 1, 0:N_OUT]                          # [1, N_OUT]

    # --- GATConv ---------------------------------------------------------
    # linear transform: h = x @ W                               [NP, F_OUT]
    h = jnp.dot(x_ref[...], w, preferred_element_type=jnp.float32)

    # per-node attention terms via one MXU matmul (instead of 2 lane reductions)
    s = jnp.dot(h, att_t, preferred_element_type=jnp.float32)   # [NP, 2]
    a_src = s[:, 0:1]                                           # [NP, 1]
    a_dst = s[:, 1:2]                                           # [NP, 1]

    # e[i, j] = LeakyReLU(a_dst[i] + a_src[j], slope=0.2) for edge j -> i
    e = a_dst + jnp.transpose(a_src)                            # [NP, NP]
    e = jnp.where(e >= 0, e, 0.2 * e)

    # masked softmax over neighbors; shift-invariant so the unmasked rowmax is
    # enough, and block-diagonal adj (with self loops) guarantees rowsum > 0.
    adj = adj_ref[...]
    p = jnp.exp(e - jnp.max(e, axis=-1, keepdims=True)) * adj
    alpha = p * pl.reciprocal(jnp.sum(p, axis=-1, keepdims=True), approx=True)
    # TODO(synk): GATConv's attention dropout (p=0.2) is omitted (eval mode no-op).

    # aggregate messages: out_i = sum_j alpha[i,j] * h[j]  (+ bias)
    gat = jnp.dot(alpha, h, preferred_element_type=jnp.float32) + bias

    # --- nn.LeakyReLU() (default negative_slope = 0.01) -------------------
    act = jnp.where(gat >= 0, gat, 0.01 * gat)

    # --- gep: global mean pool (pool rows are one-hot / node-count) -------
    pooled = jnp.dot(pool_ref[...], act, preferred_element_type=jnp.float32)  # [BG, F_OUT]

    # --- self.out: Linear(20 -> 5), then Softmax over dim=1 ---------------
    logits = jnp.dot(pooled, ow, preferred_element_type=jnp.float32) + ob
    logits = logits - jnp.max(logits, axis=-1, keepdims=True)
    ez = jnp.exp(logits)
    out_ref[...] = ez / jnp.sum(ez, axis=-1, keepdims=True)     # tiny [BG, 5]: exact


def attgnn_forward(params_slab, x, adj, pool):
    """x: [G, NP, F_IN], adj: [G, NP, NP], pool: [G, BG, NP] -> [G, BG, N_OUT]."""
    G, NP, F_in = x.shape
    BG = pool.shape[1]
    return pl.pallas_call(
        attgnn_kernel,
        out_shape=jax.ShapeDtypeStruct((G, BG, N_OUT), jnp.float32),
        grid=(G,),
        in_specs=[
            pl.BlockSpec((P_ROWS, P_COLS), lambda g: (0, 0)),     # params (resident: same block every step)
            pl.BlockSpec((None, NP, F_in), lambda g: (g, 0, 0)),  # node features
            pl.BlockSpec((None, NP, NP), lambda g: (g, 0, 0)),    # block-diag adjacency
            pl.BlockSpec((None, BG, NP), lambda g: (g, 0, 0)),    # mean-pool matrix
        ],
        out_specs=pl.BlockSpec((None, BG, N_OUT), lambda g: (g, 0, 0)),
        compiler_params=pltpu.CompilerParams(
            dimension_semantics=("parallel",)),                   # megacore split on v7x
    )(params_slab, x, adj, pool)


def _reference(x, adj, pool, w, att_src, att_dst, bias, ow, ob):
    """Pure-JAX reference of the same forward pass (exact softmax/divisions)."""
    h = jnp.einsum("gnf,fo->gno", x, w)
    a_src = jnp.sum(h * att_src, axis=-1, keepdims=True)
    a_dst = jnp.sum(h * att_dst, axis=-1, keepdims=True)
    e = a_dst + jnp.swapaxes(a_src, -1, -2)
    e = jnp.where(e >= 0, e, 0.2 * e)
    e = jnp.where(adj > 0.5, e, jnp.full_like(e, -1e30))
    e = e - jnp.max(e, axis=-1, keepdims=True)
    p = jnp.exp(e) * adj
    alpha = p / jnp.sum(p, axis=-1, keepdims=True)
    gat = jnp.einsum("gij,gjf->gif", alpha, h) + bias
    act = jnp.where(gat >= 0, gat, 0.01 * gat)
    pooled = jnp.einsum("gbn,gnf->gbf", pool, act)
    logits = jnp.einsum("gbf,fo->gbo", pooled, ow) + ob
    logits = logits - jnp.max(logits, axis=-1, keepdims=True)
    ez = jnp.exp(logits)
    return ez / jnp.sum(ez, axis=-1, keepdims=True)


if __name__ == "__main__":
    # ---- batched synthetic graphs --------------------------------------------
    # G grid steps (graph-groups); each group packs BG ring graphs of 32 nodes
    # block-diagonally into NP=128 nodes (MXU-friendly M dimension).
    G, NP, BG = 2, 128, 4
    npg = NP // BG                      # nodes per graph

    adj_np = np.zeros((G, NP, NP), dtype=np.float32)
    pool_np = np.zeros((G, BG, NP), dtype=np.float32)
    for g in range(G):
        for b in range(BG):
            base = b * npg
            for i in range(npg):
                s, d = base + i, base + (i + 1) % npg
                adj_np[g, d, s] = 1.0   # edge s -> d   (adj[target, source])
                adj_np[g, s, d] = 1.0   # edge d -> s
                adj_np[g, s, s] = 1.0   # self loop (as GATConv adds)
            pool_np[g, b, base:base + npg] = 1.0 / npg

    # ---- deterministic parameters (shapes from AttGNN.__init__) --------------
    key = jax.random.PRNGKey(0)
    ks = jax.random.split(key, 6)
    w = jax.random.normal(ks[0], (F_IN, F_OUT), jnp.float32) * 0.1   # GATConv lin
    att_src = jax.random.normal(ks[1], (1, F_OUT), jnp.float32) * 0.1
    att_dst = jax.random.normal(ks[2], (1, F_OUT), jnp.float32) * 0.1
    bias = jnp.zeros((1, F_OUT), jnp.float32)                        # GATConv bias
    ow = jax.random.normal(ks[3], (F_OUT, N_OUT), jnp.float32) * 0.1 # self.out weight.T
    ob = jnp.zeros((1, N_OUT), jnp.float32)                          # self.out bias
    x = jax.random.normal(ks[4], (G, NP, F_IN), jnp.float32)

    # ---- pack all parameters into one slab (single DMA) ----------------------
    slab = np.zeros((P_ROWS, P_COLS), dtype=np.float32)
    slab[ROW_W:ROW_W + F_IN, 0:F_OUT] = np.asarray(w)
    slab[ROW_ATT:ROW_ATT + F_OUT, 0] = np.asarray(att_src)[0]
    slab[ROW_ATT:ROW_ATT + F_OUT, 1] = np.asarray(att_dst)[0]
    slab[ROW_B, 0:F_OUT] = np.asarray(bias)[0]
    slab[ROW_OW:ROW_OW + F_OUT, 0:N_OUT] = np.asarray(ow)
    slab[ROW_OB, 0:N_OUT] = np.asarray(ob)[0]

    params_slab = jnp.asarray(slab)
    adj = jnp.asarray(adj_np)
    pool = jnp.asarray(pool_np)

    out = attgnn_forward(params_slab, x, adj, pool)
    out = jax.block_until_ready(out)

    # ---- sanity checks: shape, finiteness, softmax rows, match JAX reference ---
    out_np = np.asarray(out)
    assert out_np.shape == (G, BG, N_OUT)
    assert np.all(np.isfinite(out_np))
    assert np.allclose(out_np.sum(axis=-1), 1.0, atol=5e-3)

    ref = np.asarray(_reference(x, adj, pool, w, att_src, att_dst, bias, ow, ob))
    assert np.allclose(out_np, ref, rtol=5e-3, atol=5e-3)

    print("KERNEL_OK")
</pallas_src>

<mosaic_0001>
module attributes {stable_mosaic.version = 11 : i64} {
  func.func @attgnn_kernel(%arg0: i32, %arg1: memref<88x20xf32, #tpu.memory_space<vmem>>, %arg2: memref<1x128x20xf32, #tpu.memory_space<vmem>>, %arg3: memref<1x128x128xf32, #tpu.memory_space<vmem>>, %arg4: memref<1x4x128xf32, #tpu.memory_space<vmem>>, %arg5: memref<1x4x5xf32, #tpu.memory_space<vmem>>) attributes {dimension_semantics = [#tpu.dimension_semantics<parallel>], iteration_bounds = array<i64: 2>, scalar_prefetch = 0 : i64, scratch_operands = 0 : i64, tpu.core_type = #tpu.core_type<tc>, window_params = [{pipeline_mode = #tpu.pipeline_mode<synchronous>, transform_indices = @transform_0, window_bounds = array<i64: 88, 20>}, {transform_indices = @transform_1, window_bounds = array<i64: 1, 128, 20>}, {transform_indices = @transform_2, window_bounds = array<i64: 1, 128, 128>}, {transform_indices = @transform_3, window_bounds = array<i64: 1, 4, 128>}, {transform_indices = @transform_4, window_bounds = array<i64: 1, 4, 5>}]} {
    %c0 = arith.constant 0 : index
    %c0_0 = arith.constant 0 : index
    %0 = vector.load %arg1[%c0, %c0_0] : memref<88x20xf32, #tpu.memory_space<vmem>>, vector<88x20xf32>
    %1 = vector.extract_strided_slice %0 {offsets = [0, 0], sizes = [20, 20], strides = [1, 1]} : vector<88x20xf32> to vector<20x20xf32>
    %2 = vector.extract_strided_slice %0 {offsets = [24, 0], sizes = [20, 2], strides = [1, 1]} : vector<88x20xf32> to vector<20x2xf32>
    %3 = vector.extract_strided_slice %0 {offsets = [48, 0], sizes = [1, 20], strides = [1, 1]} : vector<88x20xf32> to vector<1x20xf32>
    %4 = vector.extract_strided_slice %0 {offsets = [56, 0], sizes = [20, 5], strides = [1, 1]} : vector<88x20xf32> to vector<20x5xf32>
    %5 = vector.extract_strided_slice %0 {offsets = [80, 0], sizes = [1, 5], strides = [1, 1]} : vector<88x20xf32> to vector<1x5xf32>
    %c0_1 = arith.constant 0 : index
    %c0_2 = arith.constant 0 : index
    %c0_3 = arith.constant 0 : index
    %6 = vector.load %arg2[%c0_1, %c0_2, %c0_3] : memref<1x128x20xf32, #tpu.memory_space<vmem>>, vector<1x128x20xf32>
    %7 = vector.shape_cast %6 : vector<1x128x20xf32> to vector<128x20xf32>
    %cst = arith.constant dense<0.000000e+00> : vector<128x20xf32>
    %8 = tpu.matmul %7, %1, %cst {dimension_numbers = #tpu.dot_dimension_numbers<[1], [0], [0], [1], [0, 0, 1, 1], [], []>} : vector<128x20xf32>, vector<20x20xf32>, vector<128x20xf32> -> vector<128x20xf32>
    %cst_4 = arith.constant dense<0.000000e+00> : vector<128x2xf32>
    %9 = tpu.matmul %8, %2, %cst_4 {dimension_numbers = #tpu.dot_dimension_numbers<[1], [0], [0], [1], [0, 0, 1, 1], [], []>} : vector<128x20xf32>, vector<20x2xf32>, vector<128x2xf32> -> vector<128x2xf32>
    %10 = vector.extract_strided_slice %9 {offsets = [0, 0], sizes = [128, 1], strides = [1, 1]} : vector<128x2xf32> to vector<128x1xf32>
    %11 = vector.extract_strided_slice %9 {offsets = [0, 1], sizes = [128, 1], strides = [1, 1]} : vector<128x2xf32> to vector<128x1xf32>
    %12 = tpu.transpose %10, [1, 0] : vector<128x1xf32> -> vector<1x128xf32>
    %13 = vector.broadcast %11 : vector<128x1xf32> to vector<128x128xf32>
    %14 = vector.broadcast %12 : vector<1x128xf32> to vector<128x128xf32>
    %15 = arith.addf %13, %14 : vector<128x128xf32>
    %cst_5 = arith.constant 0.000000e+00 : f32
    %16 = vector.broadcast %cst_5 : f32 to vector<128x128xf32>
    %17 = arith.cmpf oge, %15, %16 : vector<128x128xf32>
    %cst_6 = arith.constant 2.000000e-01 : f32
    %18 = vector.broadcast %cst_6 : f32 to vector<128x128xf32>
    %19 = arith.mulf %18, %15 : vector<128x128xf32>
    %20 = arith.select %17, %15, %19 : vector<128x128xi1>, vector<128x128xf32>
    %c0_7 = arith.constant 0 : index
    %c0_8 = arith.constant 0 : index
    %c0_9 = arith.constant 0 : index
    %21 = vector.load %arg3[%c0_7, %c0_8, %c0_9] : memref<1x128x128xf32, #tpu.memory_space<vmem>>, vector<1x128x128xf32>
    %22 = vector.shape_cast %21 : vector<1x128x128xf32> to vector<128x128xf32>
    %cst_10 = arith.constant dense<0xFF800000> : vector<128xf32>
    %23 = vector.multi_reduction <maximumf>, %20, %cst_10 [1] : vector<128x128xf32> to vector<128xf32>
    %24 = vector.shape_cast %23 : vector<128xf32> to vector<128x1xf32>
    %25 = vector.broadcast %24 : vector<128x1xf32> to vector<128x128xf32>
    %26 = arith.subf %20, %25 : vector<128x128xf32>
    %27 = math.exp %26 : vector<128x128xf32>
    %28 = arith.mulf %27, %22 : vector<128x128xf32>
    %cst_11 = arith.constant dense<0.000000e+00> : vector<128xf32>
    %29 = vector.multi_reduction <add>, %28, %cst_11 [1] : vector<128x128xf32> to vector<128xf32>
    %30 = vector.shape_cast %29 : vector<128xf32> to vector<128x1xf32>
    %31 = tpu.reciprocal %30 {approx = true} : vector<128x1xf32> -> vector<128x1xf32>
    %32 = vector.broadcast %31 : vector<128x1xf32> to vector<128x128xf32>
    %33 = arith.mulf %28, %32 : vector<128x128xf32>
    %cst_12 = arith.constant dense<0.000000e+00> : vector<128x20xf32>
    %34 = tpu.matmul %33, %8, %cst_12 {dimension_numbers = #tpu.dot_dimension_numbers<[1], [0], [0], [1], [0, 0, 1, 1], [], []>} : vector<128x128xf32>, vector<128x20xf32>, vector<128x20xf32> -> vector<128x20xf32>
    %35 = vector.broadcast %3 : vector<1x20xf32> to vector<128x20xf32>
    %36 = arith.addf %34, %35 : vector<128x20xf32>
    %cst_13 = arith.constant 0.000000e+00 : f32
    %37 = vector.broadcast %cst_13 : f32 to vector<128x20xf32>
    %38 = arith.cmpf oge, %36, %37 : vector<128x20xf32>
    %cst_14 = arith.constant 0.00999999977 : f32
    %39 = vector.broadcast %cst_14 : f32 to vector<128x20xf32>
    %40 = arith.mulf %39, %36 : vector<128x20xf32>
    %41 = arith.select %38, %36, %40 : vector<128x20xi1>, vector<128x20xf32>
    %c0_15 = arith.constant 0 : index
    %c0_16 = arith.constant 0 : index
    %c0_17 = arith.constant 0 : index
    %42 = vector.load %arg4[%c0_15, %c0_16, %c0_17] : memref<1x4x128xf32, #tpu.memory_space<vmem>>, vector<1x4x128xf32>
    %43 = vector.shape_cast %42 : vector<1x4x128xf32> to vector<4x128xf32>
    %cst_18 = arith.constant dense<0.000000e+00> : vector<4x20xf32>
    %44 = tpu.matmul %43, %41, %cst_18 {dimension_numbers = #tpu.dot_dimension_numbers<[1], [0], [0], [1], [0, 0, 1, 1], [], []>} : vector<4x128xf32>, vector<128x20xf32>, vector<4x20xf32> -> vector<4x20xf32>
    %cst_19 = arith.constant dense<0.000000e+00> : vector<4x5xf32>
    %45 = tpu.matmul %44, %4, %cst_19 {dimension_numbers = #tpu.dot_dimension_numbers<[1], [0], [0], [1], [0, 0, 1, 1], [], []>} : vector<4x20xf32>, vector<20x5xf32>, vector<4x5xf32> -> vector<4x5xf32>
    %46 = vector.broadcast %5 : vector<1x5xf32> to vector<4x5xf32>
    %47 = arith.addf %45, %46 : vector<4x5xf32>
    %cst_20 = arith.constant dense<0xFF800000> : vector<4xf32>
    %48 = vector.multi_reduction <maximumf>, %47, %cst_20 [1] : vector<4x5xf32> to vector<4xf32>
    %49 = vector.shape_cast %48 : vector<4xf32> to vector<4x1xf32>
    %50 = vector.broadcast %49 : vector<4x1xf32> to vector<4x5xf32>
    %51 = arith.subf %47, %50 : vector<4x5xf32>
    %52 = math.exp %51 : vector<4x5xf32>
    %cst_21 = arith.constant dense<0.000000e+00> : vector<4xf32>
    %53 = vector.multi_reduction <add>, %52, %cst_21 [1] : vector<4x5xf32> to vector<4xf32>
    %54 = vector.shape_cast %53 : vector<4xf32> to vector<4x1xf32>
    %55 = vector.broadcast %54 : vector<4x1xf32> to vector<4x5xf32>
    %56 = arith.divf %52, %55 : vector<4x5xf32>
    %c0_22 = arith.constant 0 : index
    %c0_23 = arith.constant 0 : index
    %c0_24 = arith.constant 0 : index
    %57 = vector.load %arg5[%c0_22, %c0_23, %c0_24] : memref<1x4x5xf32, #tpu.memory_space<vmem>>, vector<1x4x5xf32>
    %58 = vector.shape_cast %57 : vector<1x4x5xf32> to vector<4x5xf32>
    %59 = vector.shape_cast %56 : vector<4x5xf32> to vector<1x4x5xf32>
    tpu.vector_store %arg5[%c0_22, %c0_23, %c0_24], %59 {strides = array<i32>} : memref<1x4x5xf32, #tpu.memory_space<vmem>>, vector<1x4x5xf32>,
    return
  }
  func.func @transform_0(%arg0: i32) -> (i32, i32) {
    %c0_i32 = arith.constant 0 : i32
    %c0_i32_0 = arith.constant 0 : i32
    %c0_i32_1 = arith.constant 0 : i32
    return %c0_i32, %c0_i32_0 : i32, i32
  }
  func.func @transform_1(%arg0: i32) -> (i32, i32, i32) {
    %c0_i32 = arith.constant 0 : i32
    %c0_i32_0 = arith.constant 0 : i32
    %c0_i32_1 = arith.constant 0 : i32
    return %arg0, %c0_i32, %c0_i32_0 : i32, i32, i32
  }
  func.func @transform_2(%arg0: i32) -> (i32, i32, i32) {
    %c0_i32 = arith.constant 0 : i32
    %c0_i32_0 = arith.constant 0 : i32
    %c0_i32_1 = arith.constant 0 : i32
    return %arg0, %c0_i32, %c0_i32_0 : i32, i32, i32
  }
  func.func @transform_3(%arg0: i32) -> (i32, i32, i32) {
    %c0_i32 = arith.constant 0 : i32
    %c0_i32_0 = arith.constant 0 : i32
    %c0_i32_1 = arith.constant 0 : i32
    return %arg0, %c0_i32, %c0_i32_0 : i32, i32, i32
  }
  func.func @transform_4(%arg0: i32) -> (i32, i32, i32) {
    %c0_i32 = arith.constant 0 : i32
    %c0_i32_0 = arith.constant 0 : i32
    %c0_i32_1 = arith.constant 0 : i32
    return %arg0, %c0_i32, %c0_i32_0 : i32, i32, i32
  }
}

</mosaic_0001>

<bundles_post_ra>
// kernel: tpu_custom_call.1
= control target key start
LH: loop header
LB: loop body
LE: loop exit
PB: predicated region body
PF: predicated region fallthrough
CT: control target
= control target key end

     0   :  { %9 = vsyncpa [#allocation3], 0  ;;  %s2458_s0 = inlined_call_operand.vmem [shape: f32[88,20], index: 0, kind: input, shape index: {}]   ;;  %s2459_s1 = inlined_call_operand.vmem [shape: f32[2,128,20], index: 1, kind: input, shape index: {}]   ;;  %s2460_s2 = inlined_call_operand.vmem [shape: f32[2,128,128], index: 2, kind: input, shape index: {}]   ;;  %s2461_s3 = inlined_call_operand.vmem [shape: f32[2,4,128], index: 3, kind: input, shape index: {}]   ;;  %s2462_s4 = inlined_call_operand.hbm [shape: f32[2,4,5], index: 4, kind: output, shape index: {}]  }
   0x1   :  { %11 = vsyncpa [#allocation3 + $0x1], 0  ;;  %s2045_s15 = smov 0   ;;  %s2047_s16 = smov 0  }
   0x2   :  { %s2049_s17 = smov 0   ;;  %s2051_s18 = smov 0  }
   0x3 LB: > { %s2066_s19 = sadd.s32 4294967295, %s2013_s18   ;;  %s1468_s20 = sadd.s32 4294967294, %s2013_s18   ;;  %s2013_s18 = sphi %s2051_s18, %s2468_s18   ;;  %s2009_s17 = sphi %s2049_s17, %s2467_s17   ;;  %s2005_s16 = sphi %s2047_s16, %s2466_s16   ;;  %s2001_s15 = sphi %s2045_s15, %s2465_s15  }
   0x4   : > { %s2070_s21 = sadd.s32 1, %s2013_s18   ;;  %s123_s22 = sadd.s32 1, %s2009_s17 }
   0x5   : > { %s120_s23 = ssub.s32 %s2013_s18, %s2070_s21  ;;  %p133_p0 = scmp.ne.s32.totalorder %s2009_s17, %s2005_s16 }
   0x6   : > { %p121_p1 = scmp.eq.s32.totalorder %s120_s23, 0  ;;  %p134_p2 = scmp.eq.s32.totalorder %s2066_s19, 1 }
   0x7   : > { %p139_p3 = scmp.ne.s32.totalorder %s2005_s16, %s2001_s15  ;;  %p140_p4 = scmp.eq.s32.totalorder %s1468_s20, 1 }
   0x8   : > { %s2081_s24 = scalar_select %p121_p1, %s2009_s17, %s123_s22  }
   0x9   : > { %p2083_p5 = por %p134_p2, %p133_p0  ;;  %p2087_p6 = por %p140_p4, %p139_p3 }
   0xa   : > { %p1471_p7 = scmp.ge.s32.totalorder %s2013_s18, 1  ;;  %p184_p8 = scmp.lt.s32.totalorder %s2013_s18, 3 }
   0xc   : > { %p185_p9 = pnand %p1471_p7, %p184_p8 }
   0xd   : > { %v233_v0 = vld [vmem:[%s2458_s0] sm:$0xff] (!%p185_p9)  ;;  %v234_v1 = vld [vmem:[%s2458_s0 + $0x8] sm:$0xff] (!%p185_p9)  ;;  %p219_p10 = scmp.lt.s32.totalorder (!%p185_p9), %s2066_s19, 1  ;;  %v236_v3 = vld [vmem:[%s2458_s0 + $0x18] sm:$0xff] (!%p185_p9)  ;;  %vm309_vm0 = vcmask (!%p185_p9), 1043456   ;;  %vm260_vm1 = vcmask (!%p185_p9), 162816  }
   0xe   : > { %188 = sbr.rel (%p185_p9) target bundleno = 1991 (0x7c7), region = 36  ;;  %v1771_v2 = vpack.c.bf16 (!%p185_p9), %v234_v1, %v233_v0  ;;  %v237_v4 = vld [vmem:[%s2458_s0 + $0x20] sm:$0xff] (!%p185_p9)  ;;  %v235_v5 = vld [vmem:[%s2458_s0 + $0x10] sm:$0xff] (!%p185_p9)  ;;  %v238_v23 = vld [vmem:[%s2458_s0 + $0x28] sm:$0xff] (!%p185_p9)  ;;  %v2015_v24 = vmov (!%p185_p9), 1   ;;  %s216_s27 = sand.u32 (!%p185_p9), 1, %s2005_s16  }
   0xf   : > { %v1775_v6 = vpack.c.bf16 (!%p185_p9), %v237_v4, %v236_v3  ;;  %1881 = vset.pattern.permute.xlu0 (!%p185_p9), %v2015_v24  ;;  %1882 = vset.pattern.permute.xlu1 (!%p185_p9), %v2015_v24  ;;  %s1472_s28 = sshll.u32 (!%p185_p9), %s216_s27, 2 }
  0x10   : > { %1772 = vmatprep.subr.bf16.mxu0 (!%p185_p9), %v1771_v2  ;;  %s218_s30 = scalar_lea.vmem (!%p185_p9), [#allocation2], %s1472_s28 }
  0x11   : > { %1774 = vmatpush3.bf16.msra.mxu0 (!%p185_p9), %v1771_v2  ;;  %1776 = vmatprep.subr.bf16.mxu1 (!%p185_p9), %v1775_v6  ;;  %s1385_s5 = sshll.u32 (!%p185_p9), %s218_s30, 4  ;;  %s2417_s5 = int_to_ptr.vmem [resolvable:$true] %s1385_s5 }
  0x12   : > { %1615 = vmatprep.subr.msk.mxu0 (!%p185_p9), %vm309_vm0, %v235_v5  ;;  %1778 = vmatpush3.bf16.msra.mxu1 (!%p185_p9), %v1775_v6  ;;  %s1951_s10 = scalar_lea.vmem (!%p185_p9), %s2417_s5, 64 }
  0x13   : > { %1645 = vmatprep.subr.msk.mxu1 (!%p185_p9), %vm309_vm0, %v238_v23  ;;  %p1952_p11 = scmp.ne.s32.totalorder (!%p185_p9), %s2417_s5, %s1951_s10 }
  0x15   : > { %s2110_s11 = scalar_select %p219_p10, %s2066_s19, 1  ;;  %1616 = vmatpush3.msk.msra.mxu0 %vm309_vm0, %v235_v5 }
  0x16   : > { %1646 = vmatpush3.msk.msra.mxu1 %vm309_vm0, %v238_v23  ;;  %p1953_p12 = pnand %p1952_p11, %p2083_p5 }
  0x17   : > { %s1518_s12 = sshll.u32 %s2110_s11, 7  ;;  %s1477_s6 = sshll.u32 %s2110_s11, 2 }
  0x18   : > { %s2119_s20 = scalar_lea.vmem %s2459_s1, %s1518_s12  ;;  %s2258_s29 = scalar_lea.vmem %s2460_s2, %s1518_s12 }
  0x19   : > { %v244_v7 = vld [vmem:[%s2119_s20] sm:$0xff]  ;;  %v245_v8 = vld [vmem:[%s2119_s20 + $0x8] sm:$0xff]  ;;  %v246_v9 = vld [vmem:[%s2119_s20 + $0x10] sm:$0xff]  ;;  %s232_s9 = scalar_lea.vmem %s2461_s3, %s1477_s6  ;;  %p1954_p13 = pneg %p1953_p12 }
  0x1a   : > { %1617 = vmatprep.mubr.msk.f32.mxu0 %vm260_vm1, %v244_v7  ;;  %v247_v10 = vld [vmem:[%s2119_s20 + $0x18] sm:$0xff]  ;;  %v248_v11 = vld [vmem:[%s2119_s20 + $0x20] sm:$0xff]  ;;  %v249_v12 = vld [vmem:[%s2119_s20 + $0x28] sm:$0xff] }
  0x1b   : > { %1618 = vmatmul.mubr.msk.f32.vlgmr.msra.gmra.mrb[0].mxu0 %vm260_vm1, %v245_v8  ;;  %v250_v13 = vld [vmem:[%s2119_s20 + $0x30] sm:$0xff]  ;;  %v251_v14 = vld [vmem:[%s2119_s20 + $0x38] sm:$0xff]  ;;  %v252_v15 = vld [vmem:[%s2119_s20 + $0x40] sm:$0xff] }
  0x1c   : > { %1620 = vmatprep.mubr.msk.f32.mxu0 %vm260_vm1, %v246_v9  ;;  %v253_v16 = vld [vmem:[%s2119_s20 + $0x48] sm:$0xff]  ;;  %v254_v17 = vld [vmem:[%s2119_s20 + $0x50] sm:$0xff]  ;;  %v255_v18 = vld [vmem:[%s2119_s20 + $0x58] sm:$0xff] }
  0x1d   : > { %v256_v19 = vld [vmem:[%s2119_s20 + $0x60] sm:$0xff]  ;;  %v257_v20 = vld [vmem:[%s2119_s20 + $0x68] sm:$0xff]  ;;  %v258_v21 = vld [vmem:[%s2119_s20 + $0x70] sm:$0xff] }
  0x1e   : > { %v259_v22 = vld [vmem:[%s2119_s20 + $0x78] sm:$0xff] }
  0x1f   : > { %1621 = vmatmul.mubr.msk.f32.gmra.mrb[2].mxu0 %vm260_vm1, %v247_v10  ;;  %v766_v10 = vlaneseq }
  0x20   : > { %1623 = vmatprep.mubr.msk.f32.mxu0 %vm260_vm1, %v248_v11 }
  0x23   : > { %1624 = vmatmul.mubr.msk.f32.gmra.mrb[4].mxu0 %vm260_vm1, %v249_v12 }
  0x24   : > { %1626 = vmatprep.mubr.msk.f32.mxu0 %vm260_vm1, %v250_v13  ;;  %v767_v13 = vshrl.u32 %v766_v10, 7 }
  0x27   : > { %1627 = vmatmul.mubr.msk.f32.gmra.mrb[6].mxu0 %vm260_vm1, %v251_v14 }
  0x28   : > { %1629 = vmatprep.mubr.msk.f32.mxu0 %vm260_vm1, %v252_v15 }
  0x2b   : > { %1630 = vmatmul.mubr.msk.f32.gmra.mrb[8].mxu0 %vm260_vm1, %v253_v16  ;;  %v2179_v16 = vsub.s32 0, %v767_v13 }
  0x2c   : > { %1632 = vmatprep.mubr.msk.f32.mxu0 %vm260_vm1, %v254_v17 }
  0x2f   : > { %1633 = vmatmul.mubr.msk.f32.gmra.mrb[10].mxu0 %vm260_vm1, %v255_v18 }
  0x30   : > { %1635 = vmatprep.mubr.msk.f32.mxu0 %vm260_vm1, %v256_v19 }
  0x33   : > { %1636 = vmatmul.mubr.msk.f32.gmra.mrb[12].mxu0 %vm260_vm1, %v257_v20 }
  0x34   : > { %1638 = vmatprep.mubr.msk.f32.mxu0 %vm260_vm1, %v258_v21 }
  0x37   : > { %1639 = vmatmul.mubr.msk.f32.gmra.mrb[14].mxu0 %vm260_vm1, %v259_v22 }
  0xee   : > { %v1619_v25 = vpop.f32.mrb[0].mxu0 }
  0xef   : > { %v379_v26 = vpop.f32.mrb[1].mxu0 }
  0xf0   : > { %v1779_v27 = vpack.c.bf16 %v1619_v25, %v379_v26  ;;  %1647 = vmatprep.mubr.msk.f32.mxu1 %vm260_vm1, %v379_v26 }
  0xf1   : > { %1648 = vmatmul.mubr.msk.f32.vlgmr.msra.gmra.mrb[0].mxu1 %vm260_vm1, %v1619_v25 }
  0xf2   : > { %v1622_v28 = vpop.f32.mrb[2].mxu0  ;;  %1780 = vmatprep.subr.bf16.mxu0 %v1779_v27 }
  0xf3   : > { %v389_v29 = vpop.f32.mrb[3].mxu0  ;;  %1782 = vmatpush3.bf16.msra.mxu0 %v1779_v27 }
  0xf4   : > { %v1783_v30 = vpack.c.bf16 %v1622_v28, %v389_v29  ;;  %1650 = vmatprep.mubr.msk.f32.mxu1 %vm260_vm1, %v389_v29 }
  0xf5   : > { %1651 = vmatmul.mubr.msk.f32.gmra.mrb[2].mxu1 %vm260_vm1, %v1622_v28 }
  0xf6   : > { %v1625_v31 = vpop.f32.mrb[4].mxu0  ;;  %1784 = vmatprep.subr.bf16.mxu0 %v1783_v30 }
  0xf7   : > { %v399_v32 = vpop.f32.mrb[5].mxu0  ;;  %1786 = vmatpush3.bf16.msra.mxu0 %v1783_v30 }
  0xf8   : > { %v1787_v33 = vpack.c.bf16 %v1625_v31, %v399_v32  ;;  %1653 = vmatprep.mubr.msk.f32.mxu1 %vm260_vm1, %v399_v32 }
  0xf9   : > { %1654 = vmatmul.mubr.msk.f32.gmra.mrb[4].mxu1 %vm260_vm1, %v1625_v31 }
  0xfa   : > { %v1628_v34 = vpop.f32.mrb[6].mxu0  ;;  %1788 = vmatprep.subr.bf16.mxu0 %v1787_v33 }
  0xfb   : > { %v409_v35 = vpop.f32.mrb[7].mxu0  ;;  %1790 = vmatpush3.bf16.msra.mxu0 %v1787_v33 }
  0xfc   : > { %v1791_v36 = vpack.c.bf16 %v1628_v34, %v409_v35  ;;  %1656 = vmatprep.mubr.msk.f32.mxu1 %vm260_vm1, %v409_v35 }
  0xfd   : > { %1657 = vmatmul.mubr.msk.f32.gmra.mrb[6].mxu1 %vm260_vm1, %v1628_v34 }
  0xfe   : > { %v1631_v37 = vpop.f32.mrb[8].mxu0  ;;  %1792 = vmatprep.subr.bf16.mxu0 %v1791_v36 }
  0xff   : > { %v419_v38 = vpop.f32.mrb[9].mxu0  ;;  %1794 = vmatpush3.bf16.msra.mxu0 %v1791_v36 }
 0x100   : > { %v1795_v39 = vpack.c.bf16 %v1631_v37, %v419_v38  ;;  %1659 = vmatprep.mubr.msk.f32.mxu1 %vm260_vm1, %v419_v38 }
 0x101   : > { %1660 = vmatmul.mubr.msk.f32.gmra.mrb[8].mxu1 %vm260_vm1, %v1631_v37 }
 0x102   : > { %v1634_v40 = vpop.f32.mrb[10].mxu0  ;;  %1796 = vmatprep.subr.bf16.mxu0 %v1795_v39 }
 0x103   : > { %v429_v41 = vpop.f32.mrb[11].mxu0  ;;  %1798 = vmatpush3.bf16.msra.mxu0 %v1795_v39 }
 0x104   : > { %v1799_v42 = vpack.c.bf16 %v1634_v40, %v429_v41  ;;  %1662 = vmatprep.mubr.msk.f32.mxu1 %vm260_vm1, %v429_v41 }
 0x105   : > { %1663 = vmatmul.mubr.msk.f32.gmra.mrb[10].mxu1 %vm260_vm1, %v1634_v40 }
 0x106   : > { %v1637_v43 = vpop.f32.mrb[12].mxu0  ;;  %1800 = vmatprep.subr.bf16.mxu0 %v1799_v42 }
 0x107   : > { %v439_v44 = vpop.f32.mrb[13].mxu0  ;;  %1802 = vmatpush3.bf16.msra.mxu0 %v1799_v42 }
 0x108   : > { %v1803_v45 = vpack.c.bf16 %v1637_v43, %v439_v44  ;;  %1665 = vmatprep.mubr.msk.f32.mxu1 %vm260_vm1, %v439_v44 }
 0x109   : > { %1666 = vmatmul.mubr.msk.f32.gmra.mrb[12].mxu1 %vm260_vm1, %v1637_v43 }
 0x10a   : > { %1804 = vmatprep.subr.bf16.mxu0 %v1803_v45  ;;  %v1640_v46 = vpop.f32.mrb[14].mxu0 }
 0x10b   : > { %1806 = vmatpush3.bf16.msra.mxu0 %v1803_v45  ;;  %v449_v47 = vpop.f32.mrb[15].mxu0 }
 0x10c   : > { %v1807_v48 = vpack.c.bf16 %v1640_v46, %v449_v47  ;;  %1668 = vmatprep.mubr.msk.f32.mxu1 %vm260_vm1, %v449_v47 }
 0x10d   : > { %1669 = vmatmul.mubr.msk.f32.gmra.mrb[14].mxu1 %vm260_vm1, %v1640_v46 }
 0x10e   : > { %1808 = vmatprep.subr.bf16.mxu0 %v1807_v48 }
 0x10f   : > { %1810 = vmatpush3.bf16.msra.mxu0 %v1807_v48 }
 0x1c4   : > { %v1649_v49 = vpop.f32.mrb[0].mxu1 }
 0x1c5   : > { %693 = vperm.xlu0 %1881, %v1649_v49   ;;  %v575_v50 = vpop.f32.mrb[1].mxu1 }
 0x1c8   : > { %v1652_v51 = vpop.f32.mrb[2].mxu1 }
 0x1c9   : > { %688 = vperm.xlu0 %1881, %v575_v50   ;;  %703 = vperm.xlu1 %1882, %v1652_v51   ;;  %v585_v52 = vpop.f32.mrb[3].mxu1 }
 0x1cc   : > { %v1655_v53 = vpop.f32.mrb[4].mxu1 }
 0x1cd   : > { %698 = vperm.xlu1 %1882, %v585_v52   ;;  %v595_v54 = vpop.f32.mrb[5].mxu1 }
 0x1ce   : > { %708 = vperm.xlu0 %1881, %v595_v54  }
 0x1d0   : > { %v1658_v55 = vpop.f32.mrb[6].mxu1 }
 0x1d1   : > { %713 = vperm.xlu1 %1882, %v1655_v53   ;;  %v605_v56 = vpop.f32.mrb[7].mxu1 }
 0x1d2   : > { %718 = vperm.xlu0 %1881, %v605_v56  }
 0x1d4   : > { %v1661_v57 = vpop.f32.mrb[8].mxu1 }
 0x1d5   : > { %723 = vperm.xlu1 %1882, %v1658_v55   ;;  %v615_v58 = vpop.f32.mrb[9].mxu1 }
 0x1d6   : > { %728 = vperm.xlu0 %1881, %v615_v58  }
 0x1d8   : > { %v1664_v59 = vpop.f32.mrb[10].mxu1 }
 0x1d9   : > { %733 = vperm.xlu1 %1882, %v1661_v57   ;;  %v625_v60 = vpop.f32.mrb[11].mxu1 }
 0x1da   : > { %738 = vperm.xlu0 %1881, %v625_v60  }
 0x1dc   : > { %v1667_v61 = vpop.f32.mrb[12].mxu1 }
 0x1dd   : > { %743 = vperm.xlu1 %1882, %v1664_v59   ;;  %v635_v62 = vpop.f32.mrb[13].mxu1 }
 0x1de   : > { %748 = vperm.xlu0 %1881, %v635_v62  }
 0x1e0   : > { %v1670_v63 = vpop.f32.mrb[14].mxu1 }
 0x1e1   : > { %753 = vperm.xlu1 %1882, %v1667_v61   ;;  %v645_v0 = vpop.f32.mrb[15].mxu1 }
 0x1e5   : > { %758 = vperm.xlu1 %1882, %v645_v0  }
 0x1e9   : > { %763 = vperm.xlu1 %1882, %v1670_v63  }
 0x1fc   : > { %654 = vxpose.xlu0.b32.start [1/16] (narrow) %v575_v50, 8 }
 0x200   : > { %655 = vxpose.xlu0.b32.cont [2/16] (narrow) %v1649_v49, 8 }
 0x204   : > { %656 = vxpose.xlu0.b32.cont [3/16] (narrow) %v585_v52, 8 }
 0x208   : > { %657 = vxpose.xlu0.b32.cont [4/16] (narrow) %v1652_v51, 8 }
 0x20c   : > { %658 = vxpose.xlu0.b32.cont [5/16] (narrow) %v595_v54, 8 }
 0x210   : > { %659 = vxpose.xlu0.b32.cont [6/16] (narrow) %v1655_v53, 8 }
 0x214   : > { %660 = vxpose.xlu0.b32.cont [7/16] (narrow) %v605_v56, 8 }
 0x218   : > { %661 = vxpose.xlu0.b32.cont [8/16] (narrow) %v1658_v55, 8 }
 0x21c   : > { %662 = vxpose.xlu0.b32.cont [9/16] (narrow) %v615_v58, 8 }
 0x220   : > { %663 = vxpose.xlu0.b32.cont [10/16] (narrow) %v1661_v57, 8 }
 0x224   : > { %664 = vxpose.xlu0.b32.cont [11/16] (narrow) %v625_v60, 8 }
 0x228   : > { %665 = vxpose.xlu0.b32.cont [12/16] (narrow) %v1664_v59, 8 }
 0x22c   : > { %666 = vxpose.xlu0.b32.cont [13/16] (narrow) %v635_v62, 8 }
 0x230   : > { %667 = vxpose.xlu0.b32.cont [14/16] (narrow) %v1667_v61, 8 }
 0x234   : > { %668 = vxpose.xlu0.b32.cont [15/16] (narrow) %v645_v0, 8 }
 0x238   : > { %669 = vxpose.xlu0.b32.end [16/16] (narrow) %v1670_v63, 8 }
 0x244   : > { %v694_v1 = vpop.permute.xlu0 %693 }
 0x248   : > { %v689_v2 = vpop.permute.xlu0 %688  ;;  %v704_v3 = vpop.permute.xlu1 %703 }
 0x24c   : > { %v699_v4 = vpop.permute.xlu1 %698 }
 0x24d   : > { %v709_v5 = vpop.permute.xlu0 %708 }
 0x250   : > { %v714_v6 = vpop.permute.xlu1 %713 }
 0x251   : > { %v719_v7 = vpop.permute.xlu0 %718 }
 0x254   : > { %v724_v8 = vpop.permute.xlu1 %723 }
 0x255   : > { %v729_v9 = vpop.permute.xlu0 %728 }
 0x258   : > { %v734_v11 = vpop.permute.xlu1 %733 }
 0x259   : > { %v2175_v12 = vpop.permute.xlu0 %738 }
 0x25c   : > { %v744_v14 = vpop.permute.xlu1 %743 }
 0x25d   : > { %v2177_v15 = vpop.permute.xlu0 %748 }
 0x260   : > { %v754_v19 = vpop.permute.xlu1 %753 }
 0x264   : > { %v759_v56 = vpop.permute.xlu1 %758 }
 0x268   : > { %v764_v63 = vpop.permute.xlu1 %763 }
 0x27c   : > { %v670_v17 = vpop.trf.xlu0 }
 0x27d   : > { %v2182_v18 = vrot.slane %v670_v17, %v2179_v16 }
 0x27f   : > { %v783_v20 = vadd.f32 %v2182_v18, %v754_v19  ;;  %v770_v21 = vadd.f32 %v2182_v18, %v689_v2  ;;  %v771_v22 = vadd.f32 %v2182_v18, %v694_v1  ;;  %v773_v28 = vadd.f32 %v2182_v18, %v704_v3 }
 0x280   : > { %v772_v31 = vadd.f32 %v2182_v18, %v699_v4  ;;  %v775_v34 = vadd.f32 %v2182_v18, %v714_v6  ;;  %v774_v37 = vadd.f32 %v2182_v18, %v709_v5  ;;  %v777_v40 = vadd.f32 %v2182_v18, %v724_v8 }
 0x281   : > { %vm799_vm2 = vcmp.ge.f32.partialorder %v783_v20, 0.0  ;;  %v815_v23 = vmul.f32 0.2, %v783_v20  ;;  %vm786_vm3 = vcmp.ge.f32.partialorder %v770_v21, 0.0  ;;  %v802_v24 = vmul.f32 0.2, %v770_v21 }
 0x282   : > { %v803_v27 = vmul.f32 0.2, %v771_v22  ;;  %vm787_vm4 = vcmp.ge.f32.partialorder %v771_v22, 0.0  ;;  %v805_v30 = vmul.f32 0.2, %v773_v28  ;;  %vm789_vm5 = vcmp.ge.f32.partialorder %v773_v28, 0.0 }
 0x283   : > { %v2187_v25 = vsel %vm799_vm2, %v783_v20, %v815_v23  ;;  %v2189_v26 = vsel %vm786_vm3, %v770_v21, %v802_v24  ;;  %v804_v33 = vmul.f32 0.2, %v772_v31  ;;  %vm788_vm6 = vcmp.ge.f32.partialorder %v772_v31, 0.0  ;;  %v835_v24 = vld [vmem:[%s2258_s29 + $0x8] sm:$0xff] }
 0x284   : > { %876 = vmax.xlane.f32.xlu0 %v2187_v25  ;;  %850 = vmax.xlane.f32.xlu1 %v2189_v26  ;;  %v2194_v29 = vsel %vm787_vm4, %v771_v22, %v803_v27  ;;  %v2198_v32 = vsel %vm789_vm5, %v773_v28, %v805_v30  ;;  %v807_v36 = vmul.f32 0.2, %v775_v34  ;;  %vm791_vm7 = vcmp.ge.f32.partialorder %v775_v34, 0.0 }
 0x285   : > { %v2202_v35 = vsel %vm788_vm6, %v772_v31, %v804_v33  ;;  %v806_v39 = vmul.f32 0.2, %v774_v37  ;;  %vm790_vm8 = vcmp.ge.f32.partialorder %v774_v37, 0.0  ;;  %v809_v42 = vmul.f32 0.2, %v777_v40  ;;  %v837_v31 = vld [vmem:[%s2258_s29 + $0x18] sm:$0xff] }
 0x286   : > { %v2206_v38 = vsel %vm791_vm7, %v775_v34, %v807_v36  ;;  %v776_v43 = vadd.f32 %v2182_v18, %v719_v7  ;;  %vm793_vm9 = vcmp.ge.f32.partialorder %v777_v40, 0.0  ;;  %v779_v46 = vadd.f32 %v2182_v18, %v734_v11 }
 0x287   : > { %v2210_v41 = vsel %vm790_vm8, %v774_v37, %v806_v39  ;;  %v2214_v44 = vsel %vm793_vm9, %v777_v40, %v809_v42  ;;  %v778_v49 = vadd.f32 %v2182_v18, %v729_v9  ;;  %v781_v52 = vadd.f32 %v2182_v18, %v744_v14  ;;  %v836_v37 = vld [vmem:[%s2258_s29 + $0x10] sm:$0xff] }
 0x288   : > { %852 = vmax.xlane.f32.xlu1 %v2194_v29  ;;  %v808_v45 = vmul.f32 0.2, %v776_v43  ;;  %vm792_vm10 = vcmp.ge.f32.partialorder %v776_v43, 0.0  ;;  %v811_v48 = vmul.f32 0.2, %v779_v46  ;;  %vm795_vm11 = vcmp.ge.f32.partialorder %v779_v46, 0.0 }
 0x289   : > { %v810_v51 = vmul.f32 0.2, %v778_v49  ;;  %vm794_vm12 = vcmp.ge.f32.partialorder %v778_v49, 0.0  ;;  %v813_v54 = vmul.f32 0.2, %v781_v52  ;;  %v780_v55 = vadd.f32 %v2182_v18, %v2175_v12 }
 0x28a   : > { %v2218_v47 = vsel %vm792_vm10, %v776_v43, %v808_v45  ;;  %v2222_v50 = vsel %vm795_vm11, %v779_v46, %v811_v48  ;;  %vm797_vm13 = vcmp.ge.f32.partialorder %v781_v52, 0.0  ;;  %v782_v59 = vadd.f32 %v2182_v18, %v2177_v15  ;;  %v839_v43 = vld [vmem:[%s2258_s29 + $0x28] sm:$0xff] }
 0x28b   : > { %v2226_v53 = vsel %vm794_vm12, %v778_v49, %v810_v51  ;;  %v2231_v57 = vsel %vm797_vm13, %v781_v52, %v813_v54  ;;  %v812_v58 = vmul.f32 0.2, %v780_v55  ;;  %vm796_vm14 = vcmp.ge.f32.partialorder %v780_v55, 0.0  ;;  %v838_v51 = vld [vmem:[%s2258_s29 + $0x20] sm:$0xff] }
 0x28c   : > { %856 = vmax.xlane.f32.xlu1 %v2198_v32  ;;  %v814_v61 = vmul.f32 0.2, %v782_v59  ;;  %v784_v62 = vadd.f32 %v2182_v18, %v759_v56  ;;  %vm798_vm15 = vcmp.ge.f32.partialorder %v782_v59, 0.0  ;;  %v785_v0 = vadd.f32 %v2182_v18, %v764_v63  ;;  %v834_v18 = vld [vmem:[%s2258_s29] sm:$0xff] }
 0x28d   : > { %v2236_v60 = vsel %vm796_vm14, %v780_v55, %v812_v58  ;;  %vm2017_vm4 = vmmov 0  }
 0x28e   : > { %v2241_v1 = vsel %vm798_vm15, %v782_v59, %v814_v61  ;;  %v816_v2 = vmul.f32 0.2, %v784_v62  ;;  %vm800_vm2 = vcmp.ge.f32.partialorder %v784_v62, 0.0  ;;  %v817_v4 = vmul.f32 0.2, %v785_v0  ;;  %v841_v59 = vld [vmem:[%s2258_s29 + $0x38] sm:$0xff] }
 0x28f   : > { %vm801_vm3 = vcmp.ge.f32.partialorder %v785_v0, 0.0 }
 0x290   : > { %854 = vmax.xlane.f32.xlu1 %v2202_v35  ;;  %v2244_v3 = vsel %vm800_vm2, %v784_v62, %v816_v2  ;;  %v2247_v5 = vsel %vm801_vm3, %v785_v0, %v817_v4  ;;  %v840_v4 = vld [vmem:[%s2258_s29 + $0x30] sm:$0xff] }
 0x294   : > { %860 = vmax.xlane.f32.xlu1 %v2206_v38 }
 0x298   : > { %858 = vmax.xlane.f32.xlu1 %v2210_v41 }
 0x29c   : > { %864 = vmax.xlane.f32.xlu1 %v2214_v44 }
 0x2a0   : > { %862 = vmax.xlane.f32.xlu1 %v2218_v47 }
 0x2a4   : > { %868 = vmax.xlane.f32.xlu1 %v2222_v50 }
 0x2a8   : > { %866 = vmax.xlane.f32.xlu1 %v2226_v53 }
 0x2ac   : > { %872 = vmax.xlane.f32.xlu1 %v2231_v57 }
 0x2b0   : > { %870 = vmax.xlane.f32.xlu1 %v2236_v60 }
 0x2b4   : > { %874 = vmax.xlane.f32.xlu1 %v2241_v1 }
 0x2b8   : > { %878 = vmax.xlane.f32.xlu1 %v2244_v3 }
 0x2bc   : > { %880 = vmax.xlane.f32.xlu1 %v2247_v5 }
 0x311   : > { %v851_v6 = vpop.xlane.xlu1 %850  ;;  %v877_v55 = vpop.xlane.xlu0 %876 }
 0x312   : > { %v882_v7 = vsub.f32 %v2189_v26, %v851_v6  ;;  %v895_v62 = vsub.f32 %v2187_v25, %v877_v55 }
 0x314   : > { %v898_v8 = vmul.f32 1.442695, %v882_v7  ;;  %v924_v7 = vmul.f32 1.442695, %v895_v62 }
 0x315   : > { %v853_v9 = vpop.xlane.xlu1 %852 }
 0x316   : > { %v883_v10 = vsub.f32 %v2194_v29, %v853_v9  ;;  %1883 = vpow2.f32 %v898_v8 }
 0x318   : > { %v900_v11 = vmul.f32 1.442695, %v883_v10  ;;  %v843_v10 = vld [vmem:[%s2258_s29 + $0x48] sm:$0xff] }
 0x319   : > { %v857_v12 = vpop.xlane.xlu1 %856 }
 0x31a   : > { %1885 = vpow2.f32 %v900_v11  ;;  %v885_v13 = vsub.f32 %v2198_v32, %v857_v12 }
 0x31c   : > { %v904_v14 = vmul.f32 1.442695, %v885_v13 }
 0x31d   : > { %v855_v15 = vpop.xlane.xlu1 %854 }
 0x31e   : > { %1887 = vpow2.f32 %v904_v14  ;;  %v884_v17 = vsub.f32 %v2202_v35, %v855_v15  ;;  %v842_v15 = vld [vmem:[%s2258_s29 + $0x40] sm:$0xff] }
 0x320   : > { %v902_v19 = vmul.f32 1.442695, %v884_v17  ;;  %v1884_v20 = vpop.eup %1883 }
 0x321   : > { %v861_v21 = vpop.xlane.xlu1 %860  ;;  %v2263_v23 = vmul.f32 %v1884_v20, %v834_v18 }
 0x322   : > { %1889 = vpow2.f32 %v902_v19  ;;  %v887_v22 = vsub.f32 %v2206_v38, %v861_v21  ;;  %v845_v21 = vld [vmem:[%s2258_s29 + $0x58] sm:$0xff] }
 0x323   : > { %946 = vadd.xlane.f32.xlu1 %v2263_v23 }
 0x324   : > { %v1886_v26 = vpop.eup %1885  ;;  %v908_v27 = vmul.f32 1.442695, %v887_v22 }
 0x325   : > { %v859_v28 = vpop.xlane.xlu1 %858  ;;  %v2267_v29 = vmul.f32 %v1886_v26, %v835_v24 }
 0x326   : > { %1891 = vpow2.f32 %v908_v27  ;;  %v886_v30 = vsub.f32 %v2210_v41, %v859_v28 }
 0x327   : > { %948 = vadd.xlane.f32.xlu1 %v2267_v29 }
 0x328   : > { %v1888_v32 = vpop.eup %1887  ;;  %v906_v33 = vmul.f32 1.442695, %v886_v30  ;;  %v847_v30 = vld [vmem:[%s2258_s29 + $0x68] sm:$0xff] }
 0x329   : > { %v865_v34 = vpop.xlane.xlu1 %864  ;;  %v2272_v35 = vmul.f32 %v1888_v32, %v837_v31  ;;  %v844_v31 = vld [vmem:[%s2258_s29 + $0x50] sm:$0xff] }
 0x32a   : > { %1893 = vpow2.f32 %v906_v33  ;;  %v889_v36 = vsub.f32 %v2214_v44, %v865_v34 }
 0x32b   : > { %952 = vadd.xlane.f32.xlu1 %v2272_v35 }
 0x32c   : > { %v1890_v38 = vpop.eup %1889  ;;  %v912_v39 = vmul.f32 1.442695, %v889_v36  ;;  %v846_v36 = vld [vmem:[%s2258_s29 + $0x60] sm:$0xff] }
 0x32d   : > { %v863_v40 = vpop.xlane.xlu1 %862  ;;  %v2277_v41 = vmul.f32 %v1890_v38, %v836_v37 }
 0x32e   : > { %1895 = vpow2.f32 %v912_v39  ;;  %v888_v42 = vsub.f32 %v2218_v47, %v863_v40 }
 0x32f   : > { %950 = vadd.xlane.f32.xlu1 %v2277_v41 }
 0x330   : > { %v1892_v45 = vpop.eup %1891  ;;  %v910_v46 = vmul.f32 1.442695, %v888_v42  ;;  %v849_v42 = vld [vmem:[%s2258_s29 + $0x78] sm:$0xff] }
 0x331   : > { %v869_v48 = vpop.xlane.xlu1 %868  ;;  %v2282_v44 = vmul.f32 %v1892_v45, %v839_v43 }
 0x332   : > { %1897 = vpow2.f32 %v910_v46  ;;  %v891_v49 = vsub.f32 %v2222_v50, %v869_v48 }
 0x333   : > { %956 = vadd.xlane.f32.xlu1 %v2282_v44 }
 0x334   : > { %v1894_v52 = vpop.eup %1893  ;;  %v916_v54 = vmul.f32 1.442695, %v891_v49 }
 0x335   : > { %v867_v47 = vpop.xlane.xlu1 %866  ;;  %v2287_v56 = vmul.f32 %v1894_v52, %v838_v51 }
 0x336   : > { %1899 = vpow2.f32 %v916_v54  ;;  %v890_v58 = vsub.f32 %v2226_v53, %v867_v47 }
 0x337   : > { %954 = vadd.xlane.f32.xlu1 %v2287_v56 }
 0x338   : > { %v1896_v61 = vpop.eup %1895  ;;  %v914_v63 = vmul.f32 1.442695, %v890_v58 }
 0x339   : > { %v873_v50 = vpop.xlane.xlu1 %872  ;;  %v2293_v0 = vmul.f32 %v1896_v61, %v841_v59 }
 0x33a   : > { %1901 = vpow2.f32 %v914_v63  ;;  %v893_v2 = vsub.f32 %v2231_v57, %v873_v50 }
 0x33b   : > { %960 = vadd.xlane.f32.xlu1 %v2293_v0 }
 0x33c   : > { %v1898_v6 = vpop.eup %1897  ;;  %v920_v8 = vmul.f32 1.442695, %v893_v2 }
 0x33d   : > { %v871_v53 = vpop.xlane.xlu1 %870  ;;  %v2298_v9 = vmul.f32 %v1898_v6, %v840_v4 }
 0x33e   : > { %1903 = vpow2.f32 %v920_v8  ;;  %v892_v25 = vsub.f32 %v2236_v60, %v871_v53 }
 0x33f   : > { %1905 = vpow2.f32 %v924_v7  ;;  %958 = vadd.xlane.f32.xlu1 %v2298_v9 }
 0x340   : > { %v1900_v11 = vpop.eup %1899  ;;  %v918_v12 = vmul.f32 1.442695, %v892_v25 }
 0x341   : > { %v875_v57 = vpop.xlane.xlu1 %874  ;;  %v2303_v13 = vmul.f32 %v1900_v11, %v843_v10 }
 0x342   : > { %1907 = vpow2.f32 %v918_v12  ;;  %v894_v14 = vsub.f32 %v2241_v1, %v875_v57 }
 0x343   : > { %964 = vadd.xlane.f32.xlu0 %v2303_v13 }
 0x344   : > { %v1902_v17 = vpop.eup %1901  ;;  %v922_v60 = vmul.f32 1.442695, %v894_v14 }
 0x345   : > { %v879_v18 = vpop.xlane.xlu1 %878  ;;  %v2308_v19 = vmul.f32 %v1902_v17, %v842_v15 }
 0x346   : > { %1909 = vpow2.f32 %v922_v60  ;;  %v896_v20 = vsub.f32 %v2244_v3, %v879_v18 }
 0x347   : > { %962 = vadd.xlane.f32.xlu1 %v2308_v19 }
 0x348   : > { %v1904_v22 = vpop.eup %1903  ;;  %v926_v24 = vmul.f32 1.442695, %v896_v20 }
 0x349   : > { %v881_v1 = vpop.xlane.xlu1 %880  ;;  %v2313_v26 = vmul.f32 %v1904_v22, %v845_v21  ;;  %v1906_v27 = vpop.eup %1905 }
 0x34a   : > { %1911 = vpow2.f32 %v926_v24  ;;  %v897_v28 = vsub.f32 %v2247_v5, %v881_v1  ;;  %v2319_v33 = vmul.f32 %v1906_v27, %v847_v30  ;;  %v848_v5 = vld [vmem:[%s2258_s29 + $0x70] sm:$0xff]  ;;  %s1515_s29 = sshll.u32 %s2066_s19, 6  ;;  %s2019_s19 = smov [#allocation2]  }
 0x34b   : > { %968 = vadd.xlane.f32.xlu0 %v2313_v26  ;;  %s2415_s8 = scalar_lea.hbm %s2462_s4, %s1515_s29  ;;  %s1955_s12 = sshll.u32 %s2019_s19, 4  ;;  %s1956_s12 = int_to_ptr.vmem [resolvable:$false] %s1955_s12 }
 0x34c   : > { %v1908_v3 = vpop.eup %1907  ;;  %v928_v32 = vmul.f32 1.442695, %v897_v28  ;;  %s1957_s13 = scalar_lea.vmem %s1956_s12, 128  ;;  %p1958_p0 = scmp.lt.s32.totalorder %s2417_s5, %s1956_s12 }
 0x34d   : > { %v2321_v34 = vmul.f32 %v1908_v3, %v844_v31  ;;  %v2016_v31 = vmov 0.0|0.0   ;;  %v239_v3 = vld [vmem:[%s2458_s0 + $0x30] sm:$0xff]  ;;  %p1959_p1 = scmp.lt.s32.totalorder %s1957_s13, %s1951_s10 }
 0x34e   : > { %1913 = vpow2.f32 %v928_v32  ;;  %1811 = vmatprep.subr.bf16.mxu1 %v2016_v31  ;;  %v2360_v32 = vrot.slane %v239_v3, %v2179_v16 }
 0x34f   : > { %972 = vadd.xlane.f32.xlu0 %v2319_v33  ;;  %966 = vadd.xlane.f32.xlu1 %v2321_v34  ;;  %p1960_p2 = por %p1959_p1, %p1958_p0 }
 0x350   : > { %v1910_v37 = vpop.eup %1909 }
 0x351   : > { %v2326_v38 = vmul.f32 %v1910_v37, %v846_v36  ;;  %p1961_p3 = pnand %p1960_p2, %p1954_p13 }
 0x353   : > { %970 = vadd.xlane.f32.xlu1 %v2326_v38 }
 0x354   : > { %v1912_v39 = vpop.eup %1911 }
 0x355   : > { %v2330_v40 = vmul.f32 %v1912_v39, %v848_v5 }
 0x357   : > { %974 = vadd.xlane.f32.xlu1 %v2330_v40 }
 0x358   : > { %v1914_v43 = vpop.eup %1913 }
 0x359   : > { %v2334_v45 = vmul.f32 %v1914_v43, %v849_v42 }
 0x35b   : > { %976 = vadd.xlane.f32.xlu0 %v2334_v45 }
 0x3b0   : > { %v947_v46 = vpop.xlane.xlu1 %946 }
 0x3b1   : > { %1915 = vrcp.f32 %v947_v46 }
 0x3b4   : > { %v949_v48 = vpop.xlane.xlu1 %948 }
 0x3b5   : > { %1917 = vrcp.f32 %v949_v48 }
 0x3b8   : > { %v953_v49 = vpop.xlane.xlu1 %952 }
 0x3b9   : > { %1919 = vrcp.f32 %v953_v49 }
 0x3bb   : > { %v1916_v51 = vpop.eup %1915 }
 0x3bc   : > { %v951_v52 = vpop.xlane.xlu1 %950  ;;  %v994_v54 = vmul.f32 %v1916_v51, %v2263_v23 }
 0x3bd   : > { %1921 = vrcp.f32 %v951_v52 }
 0x3be   : > { %1703 = vmatprep.mubr.f32.mxu0 %v994_v54 }
 0x3bf   : > { %v1918_v55 = vpop.eup %1917 }
 0x3c0   : > { %v995_v47 = vmul.f32 %v1918_v55, %v2267_v29  ;;  %v957_v58 = vpop.xlane.xlu1 %956 }
 0x3c1   : > { %1923 = vrcp.f32 %v957_v58 }
 0x3c2   : > { %1704 = vmatmul.mubr.f32.vlgmr.msra.gmra.mrb[16].mxu0 %v995_v47 }
 0x3c3   : > { %v1920_v61 = vpop.eup %1919 }
 0x3c4   : > { %v955_v59 = vpop.xlane.xlu1 %954  ;;  %v997_v2 = vmul.f32 %v1920_v61, %v2272_v35 }
 0x3c5   : > { %1925 = vrcp.f32 %v955_v59 }
 0x3c7   : > { %v1922_v62 = vpop.eup %1921 }
 0x3c8   : > { %v961_v63 = vpop.xlane.xlu1 %960  ;;  %v996_v50 = vmul.f32 %v1922_v62, %v2277_v41 }
 0x3c9   : > { %1927 = vrcp.f32 %v961_v63 }
 0x3ca   : > { %1706 = vmatprep.mubr.f32.mxu0 %v996_v50 }
 0x3cb   : > { %1707 = vmatmul.mubr.f32.gmra.mrb[18].mxu0 %v997_v2  ;;  %v1924_v4 = vpop.eup %1923 }
 0x3cc   : > { %v959_v23 = vpop.xlane.xlu1 %958  ;;  %v999_v8 = vmul.f32 %v1924_v4, %v2282_v44 }
 0x3cd   : > { %1929 = vrcp.f32 %v959_v23 }
 0x3cf   : > { %v1926_v6 = vpop.eup %1925 }
 0x3d0   : > { %v965_v29 = vpop.xlane.xlu0 %964  ;;  %v998_v7 = vmul.f32 %v1926_v6, %v2287_v56 }
 0x3d1   : > { %1931 = vrcp.f32 %v965_v29 }
 0x3d2   : > { %1709 = vmatprep.mubr.f32.mxu0 %v998_v7 }
 0x3d3   : > { %1710 = vmatmul.mubr.f32.gmra.mrb[20].mxu0 %v999_v8  ;;  %v1928_v41 = vpop.eup %1927 }
 0x3d4   : > { %v963_v53 = vpop.xlane.xlu1 %962  ;;  %v1001_v11 = vmul.f32 %v1928_v41, %v2293_v0 }
 0x3d5   : > { %1933 = vrcp.f32 %v963_v53 }
 0x3d7   : > { %v1930_v25 = vpop.eup %1929 }
 0x3d8   : > { %v969_v35 = vpop.xlane.xlu0 %968  ;;  %v1000_v10 = vmul.f32 %v1930_v25, %v2298_v9 }
 0x3d9   : > { %1935 = vrcp.f32 %v969_v35 }
 0x3da   : > { %1712 = vmatprep.mubr.f32.mxu0 %v1000_v10 }
 0x3db   : > { %1713 = vmatmul.mubr.f32.gmra.mrb[22].mxu0 %v1001_v11  ;;  %v1932_v56 = vpop.eup %1931 }
 0x3dc   : > { %v967_v12 = vpop.xlane.xlu1 %966  ;;  %v973_v57 = vpop.xlane.xlu0 %972  ;;  %v1003_v17 = vmul.f32 %v1932_v56, %v2303_v13 }
 0x3dd   : > { %1937 = vrcp.f32 %v967_v12 }
 0x3de   : > { %1939 = vrcp.f32 %v973_v57 }
 0x3df   : > { %v1934_v44 = vpop.eup %1933 }
 0x3e0   : > { %v971_v14 = vpop.xlane.xlu1 %970  ;;  %v1002_v15 = vmul.f32 %v1934_v44, %v2308_v19 }
 0x3e1   : > { %1941 = vrcp.f32 %v971_v14 }
 0x3e2   : > { %1715 = vmatprep.mubr.f32.mxu0 %v1002_v15 }
 0x3e3   : > { %1716 = vmatmul.mubr.f32.gmra.mrb[24].mxu0 %v1003_v17  ;;  %v1936_v0 = vpop.eup %1935 }
 0x3e4   : > { %v975_v9 = vpop.xlane.xlu1 %974  ;;  %v1005_v22 = vmul.f32 %v1936_v0, %v2313_v26  ;;  %v2018_v26 = vmov 0.0  }
 0x3e5   : > { %1943 = vrcp.f32 %v975_v9  ;;  %1759 = vmatprep.mubr.msk.f32.mxu1 %vm2017_vm4, %v2018_v26 }
 0x3e7   : > { %v1938_v60 = vpop.eup %1937 }
 0x3e8   : > { %v977_v18 = vpop.xlane.xlu0 %976  ;;  %v1004_v20 = vmul.f32 %v1938_v60, %v2321_v34  ;;  %v1940_v21 = vpop.eup %1939 }
 0x3e9   : > { %1945 = vrcp.f32 %v977_v18  ;;  %v1007_v13 = vmul.f32 %v1940_v21, %v2319_v33 }
 0x3ea   : > { %1718 = vmatprep.mubr.f32.mxu0 %v1004_v20 }
 0x3eb   : > { %v1942_v24 = vpop.eup %1941  ;;  %1719 = vmatmul.mubr.f32.gmra.mrb[26].mxu0 %v1005_v22 }
 0x3ec   : > { %v1006_v19 = vmul.f32 %v1942_v24, %v2326_v38 }
 0x3ee   : > { %1721 = vmatprep.mubr.f32.mxu0 %v1006_v19 }
 0x3ef   : > { %v1944_v1 = vpop.eup %1943  ;;  %1722 = vmatmul.mubr.f32.gmra.mrb[28].mxu0 %v1007_v13 }
 0x3f0   : > { %v1008_v27 = vmul.f32 %v1944_v1, %v2330_v40 }
 0x3f2   : > { %1724 = vmatprep.mubr.f32.mxu0 %v1008_v27 }
 0x3f3   : > { %v1946_v28 = vpop.eup %1945 }
 0x3f4   : > { %v1009_v30 = vmul.f32 %v1946_v28, %v2334_v45 }
 0x3f6   : > { %1725 = vmatmul.mubr.f32.gmra.mrb[30].mxu0 %v1009_v30 }
 0x495   : > { %v1705_v33 = vpop.f32.mrb[16].mxu0 }
 0x496   : > { %v1086_v34 = vadd.f32 %v1705_v33, %v2360_v32  ;;  %v1080_v36 = vpop.f32.mrb[17].mxu0 }
 0x497   : > { %v1081_v37 = vadd.f32 %v1080_v36, %v2360_v32 }
 0x498   : > { %vm1160_vm5 = vcmp.ge.f32.partialorder %v1086_v34, 0.0  ;;  %v1176_v38 = vmul.f32 0.01, %v1086_v34 }
 0x499   : > { %vm1159_vm6 = vcmp.ge.f32.partialorder %v1081_v37, 0.0  ;;  %v1175_v5 = vmul.f32 0.01, %v1081_v37 }
 0x49a   : > { %v1192_v39 = vsel %vm1160_vm5, %v1086_v34, %v1176_v38 }
 0x49b   : > { %v1191_v40 = vsel %vm1159_vm6, %v1081_v37, %v1175_v5 }
 0x49c   : > { %v1812_v42 = vpack.c.bf16 %v1192_v39, %v1191_v40 }
 0x49e   : > { %v1708_v43 = vpop.f32.mrb[18].mxu0  ;;  %1813 = vmatpush3.bf16.msra.mxu1 %v1812_v42 }
 0x49f   : > { %v1096_v45 = vadd.f32 %v1708_v43, %v2360_v32  ;;  %v1090_v46 = vpop.f32.mrb[19].mxu0  ;;  %1814 = vmatprep.subr.bf16.mxu1 %v2016_v31 }
 0x4a0   : > { %v1091_v48 = vadd.f32 %v1090_v46, %v2360_v32  ;;  %v240_v46 = vld [vmem:[%s2458_s0 + $0x38] sm:$0xff] }
 0x4a1   : > { %vm1162_vm7 = vcmp.ge.f32.partialorder %v1096_v45, 0.0  ;;  %v1178_v49 = vmul.f32 0.01, %v1096_v45 }
 0x4a2   : > { %vm1161_vm8 = vcmp.ge.f32.partialorder %v1091_v48, 0.0  ;;  %v1177_v51 = vmul.f32 0.01, %v1091_v48 }
 0x4a3   : > { %v1194_v52 = vsel %vm1162_vm7, %v1096_v45, %v1178_v49  ;;  %v1207_v49 = vld [vmem:[%s232_s9] sm:$0xf]  ;;  %s1372_s9 = scalar_lea.sflag [#allocation3], %s216_s27 }
 0x4a4   : > { %v1193_v54 = vsel %vm1161_vm8, %v1091_v48, %v1177_v51 }
 0x4a5   : > { %v1815_v55 = vpack.c.bf16 %v1194_v52, %v1193_v54  ;;  %v242_v52 = vld [vmem:[%s2458_s0 + $0x48] sm:$0xff] }
 0x4a6   : > { %v1711_v47 = vpop.f32.mrb[20].mxu0 }
 0x4a7   : > { %v1106_v58 = vadd.f32 %v1711_v47, %v2360_v32  ;;  %v1100_v59 = vpop.f32.mrb[21].mxu0  ;;  %1816 = vmatpush3.bf16.msra.mxu1 %v1815_v55 }
 0x4a8   : > { %v1101_v61 = vadd.f32 %v1100_v59, %v2360_v32  ;;  %1817 = vmatprep.subr.bf16.mxu1 %v2016_v31 }
 0x4a9   : > { %vm1164_vm9 = vcmp.ge.f32.partialorder %v1106_v58, 0.0  ;;  %v1180_v62 = vmul.f32 0.01, %v1106_v58 }
 0x4aa   : > { %vm1163_vm10 = vcmp.ge.f32.partialorder %v1101_v61, 0.0  ;;  %v1179_v63 = vmul.f32 0.01, %v1101_v61 }
 0x4ab   : > { %v1196_v50 = vsel %vm1164_vm9, %v1106_v58, %v1180_v62 }
 0x4ac   : > { %v1195_v2 = vsel %vm1163_vm10, %v1101_v61, %v1179_v63 }
 0x4ad   : > { %v1818_v23 = vpack.c.bf16 %v1196_v50, %v1195_v2 }
 0x4ae   : > { %v1714_v4 = vpop.f32.mrb[22].mxu0 }
 0x4af   : > { %v1116_v6 = vadd.f32 %v1714_v4, %v2360_v32  ;;  %v1110_v29 = vpop.f32.mrb[23].mxu0  ;;  %1819 = vmatpush3.bf16.msra.mxu1 %v1818_v23 }
 0x4b0   : > { %v1111_v7 = vadd.f32 %v1110_v29, %v2360_v32  ;;  %1820 = vmatprep.subr.bf16.mxu1 %v2016_v31 }
 0x4b1   : > { %vm1166_vm11 = vcmp.ge.f32.partialorder %v1116_v6, 0.0  ;;  %v1182_v8 = vmul.f32 0.01, %v1116_v6 }
 0x4b2   : > { %vm1165_vm12 = vcmp.ge.f32.partialorder %v1111_v7, 0.0  ;;  %v1181_v53 = vmul.f32 0.01, %v1111_v7 }
 0x4b3   : > { %v1198_v41 = vsel %vm1166_vm11, %v1116_v6, %v1182_v8 }
 0x4b4   : > { %v1197_v25 = vsel %vm1165_vm12, %v1111_v7, %v1181_v53 }
 0x4b5   : > { %v1821_v35 = vpack.c.bf16 %v1198_v41, %v1197_v25 }
 0x4b6   : > { %v1717_v10 = vpop.f32.mrb[24].mxu0 }
 0x4b7   : > { %v1126_v11 = vadd.f32 %v1717_v10, %v2360_v32  ;;  %v1120_v12 = vpop.f32.mrb[25].mxu0  ;;  %1822 = vmatpush3.bf16.msra.mxu1 %v1821_v35 }
 0x4b8   : > { %v1121_v57 = vadd.f32 %v1120_v12, %v2360_v32  ;;  %1823 = vmatprep.subr.bf16.mxu1 %v2016_v31 }
 0x4b9   : > { %vm1168_vm13 = vcmp.ge.f32.partialorder %v1126_v11, 0.0  ;;  %v1184_v56 = vmul.f32 0.01, %v1126_v11 }
 0x4ba   : > { %vm1167_vm14 = vcmp.ge.f32.partialorder %v1121_v57, 0.0  ;;  %v1183_v44 = vmul.f32 0.01, %v1121_v57 }
 0x4bb   : > { %v1200_v14 = vsel %vm1168_vm13, %v1126_v11, %v1184_v56 }
 0x4bc   : > { %v1199_v15 = vsel %vm1167_vm14, %v1121_v57, %v1183_v44 }
 0x4bd   : > { %v1824_v17 = vpack.c.bf16 %v1200_v14, %v1199_v15 }
 0x4be   : > { %v1720_v9 = vpop.f32.mrb[26].mxu0 }
 0x4bf   : > { %1825 = vmatpush3.bf16.msra.mxu1 %v1824_v17  ;;  %v1136_v0 = vadd.f32 %v1720_v9, %v2360_v32  ;;  %v1130_v60 = vpop.f32.mrb[27].mxu0 }
 0x4c0   : > { %1826 = vmatprep.subr.bf16.mxu1 %v2016_v31  ;;  %v1131_v18 = vadd.f32 %v1130_v60, %v2360_v32 }
 0x4c1   : > { %vm1170_vm15 = vcmp.ge.f32.partialorder %v1136_v0, 0.0  ;;  %v1186_v20 = vmul.f32 0.01, %v1136_v0 }
 0x4c2   : > { %vm1169_vm2 = vcmp.ge.f32.partialorder %v1131_v18, 0.0  ;;  %v1185_v21 = vmul.f32 0.01, %v1131_v18  ;;  %v1723_v22 = vpop.f32.mrb[28].mxu0 }
 0x4c3   : > { %v1202_v24 = vsel %vm1170_vm15, %v1136_v0, %v1186_v20  ;;  %v1146_v19 = vadd.f32 %v1723_v22, %v2360_v32  ;;  %v1140_v13 = vpop.f32.mrb[29].mxu0 }
 0x4c4   : > { %v1201_v1 = vsel %vm1169_vm2, %v1131_v18, %v1185_v21  ;;  %v1141_v27 = vadd.f32 %v1140_v13, %v2360_v32 }
 0x4c5   : > { %v1827_v28 = vpack.c.bf16 %v1202_v24, %v1201_v1  ;;  %vm1172_vm3 = vcmp.ge.f32.partialorder %v1146_v19, 0.0  ;;  %v1188_v30 = vmul.f32 0.01, %v1146_v19 }
 0x4c6   : > { %vm1171_vm5 = vcmp.ge.f32.partialorder %v1141_v27, 0.0  ;;  %v1187_v3 = vmul.f32 0.01, %v1141_v27 }
 0x4c7   : > { %v1204_v33 = vsel %vm1172_vm3, %v1146_v19, %v1188_v30  ;;  %1828 = vmatpush3.bf16.msra.mxu1 %v1827_v28 }
 0x4c8   : > { %v1203_v34 = vsel %vm1171_vm5, %v1141_v27, %v1187_v3  ;;  %1829 = vmatprep.subr.bf16.mxu1 %v2016_v31 }
 0x4c9   : > { %v1726_v36 = vpop.f32.mrb[30].mxu0  ;;  %v1830_v37 = vpack.c.bf16 %v1204_v33, %v1203_v34 }
 0x4ca   : > { %v1156_v38 = vadd.f32 %v1726_v36, %v2360_v32  ;;  %v1150_v5 = vpop.f32.mrb[31].mxu0 }
 0x4cb   : > { %v1151_v39 = vadd.f32 %v1150_v5, %v2360_v32  ;;  %1831 = vmatpush3.bf16.msra.mxu1 %v1830_v37  ;;  %v241_v32 = vld [vmem:[%s2458_s0 + $0x40] sm:$0xff] }
 0x4cc   : > { %vm1174_vm6 = vcmp.ge.f32.partialorder %v1156_v38, 0.0  ;;  %v1190_v40 = vmul.f32 0.01, %v1156_v38  ;;  %1832 = vmatprep.subr.bf16.mxu1 %v2016_v31  ;;  %v1836_v51 = vpack.c.bf16 %v241_v32, %v240_v46 }
 0x4cd   : > { %vm1173_vm7 = vcmp.ge.f32.partialorder %v1151_v39, 0.0  ;;  %v1189_v42 = vmul.f32 0.01, %v1151_v39 }
 0x4ce   : > { %v1206_v43 = vsel %vm1174_vm6, %v1156_v38, %v1190_v40 }
 0x4cf   : > { %v1205_v45 = vsel %vm1173_vm7, %v1151_v39, %v1189_v42 }
 0x4d0   : > { %v1833_v48 = vpack.c.bf16 %v1206_v43, %v1205_v45 }
 0x4d2   : > { %1834 = vmatpush3.bf16.msra.mxu1 %v1833_v48 }
 0x4d3   : > { %1835 = vmatprep.subr.bf16.mxu1 %v2016_v31  ;;  %v243_v31 = vld [vmem:[%s2458_s0 + $0x50] sm:$0xff] }
 0x4d4   : > { %v1281_v47 = vrot.slane %v243_v31, %v2179_v16 }
 0x4d5   : > { %1760 = vmatmul.mubr.f32.vlgmr.msra.gmra.mrb[16].mxu1 %v1207_v49 }
 0x4d6   : > { %1837 = vmatpush3.bf16.msra.mxu1 %v1836_v51  ;;  %1768 = vmatprep.mubr.msk.f32.mxu1 %vm2017_vm4, %v2018_v26  ;;  %vm1358_vm4 = vcmask 35840  }
 0x4d7   : > { %1766 = vmatprep.subr.mxu1 %v2018_v26 }
 0x4da   : > { %1767 = vmatpush3.msk.msra.mxu1 %vm309_vm0, %v242_v52 }
 0x5a8   : > { %v1274_v54 = vpop.f32.mrb[16].mxu1 }
 0x5a9   : > { %v1761_v55 = vpop.f32.mrb[17].mxu1  ;;  %1769 = vmatmul.mubr.msk.f32.vlgmr.msra.gmra.mrb[18].mxu1 %vm260_vm1, %v1274_v54 }
 0x67c   : > { %v1354_v58 = vpop.f32.mrb[18].mxu1 }
 0x67d   : > { %v1355_v26 = vadd.f32 %v1354_v58, %v1281_v47  ;;  %v1770_v59 = vpop.f32.mrb[19].mxu1 }
 0x67f   : > { %v1359_v61 = vsel %vm1358_vm4, %v1355_v26, -inf }
 0x680   : > { %1360 = vmax.xlane.f32.xlu1 %v1359_v61 }
 0x70d   : > { %v1361_v62 = vpop.xlane.xlu1 %1360 }
 0x70e   : > { %v1362_v63 = vsub.f32 %v1355_v26, %v1361_v62 }
 0x710   : > { %v1363_v50 = vmul.f32 1.442695, %v1362_v63 }
 0x712   : > { %1947 = vpow2.f32 %v1363_v50 }
 0x71c   : > { %v1948_v2 = vpop.eup %1947 }
 0x71d   : > { %v1365_v23 = vsel %vm1358_vm4, %v1948_v2, 0.0 }
 0x71e   : > { %1366 = vadd.xlane.f32.xlu0 %v1365_v23 }
 0x7ab   : > { %v1367_v4 = vpop.xlane.xlu0 %1366 }
 0x7ac   : > { %1949 = vrcp.f32 %v1367_v4 }
 0x7b6   : > { %v1950_v16 = vpop.eup %1949 }
 0x7b7   : > { %v1369_v6 = vmul.f32 %v1950_v16, %v1948_v2 }
 0x7b9   : > { %1370 = vst.msk [vmem:[%s218_s30] sm:$0xf] %vm1358_vm4, %v1369_v6 }
 0x7ba   : > { %1964 = shalt.err (!%p1961_p3)
}
 0x7bb   : > { %s1965_s14 = scalar_lea.hbm %s2415_s8, 64  ;;  %s1969_s22 = scalar_lea.hbm %s2462_s4, 128 }
 0x7bc   : > { %p1966_p4 = scmp.ne.s32.totalorder %s2415_s8, %s1965_s14  ;;  %p1970_p9 = scmp.lt.u32.totalorder %s2415_s8, %s2462_s4 }
 0x7bd   : > { %p1971_p10 = scmp.lt.u32.totalorder %s1969_s22, %s1965_s14  ;;  %p1973_p12 = scmp.lt.u32.totalorder %s1965_s14, %s2415_s8 }
 0x7be   : > { %p1967_p7 = pnand %p1966_p4, %p2083_p5 }
 0x7bf   : > { %p1972_p11 = por %p1971_p10, %p1970_p9 }
 0x7c0   : > { %p1968_p8 = pneg %p1967_p7 }
 0x7c1   : > { %p1974_p13 = por %p1973_p12, %p1972_p11 }
 0x7c3   : > { %p1975_p0 = pnand %p1974_p13, %p1968_p8 }
 0x7c5   : > { %1978 = shalt.err (!%p1975_p0)
}
 0x7c6   : > { %1838 = dma.vmem_to_hbm [thread:$0]  (%p2083_p5), %s2417_s5, 64, %s2415_s8, %s1372_s9  }
 0x7c7 PF: > { %p1844_p1 = scmp.ge.s32.totalorder %s2013_s18, 2  ;;  %s1397_s28 = sand.u32 1, %s2001_s15  }
 0x7c8   : > { %s1398_s29 = scalar_lea.sflag [#allocation3], %s1397_s28 }
 0x7c9   : > { %p1841_p2 = pnand %p1844_p1, %p2087_p6 }
 0x7cb   : > { %1996 = dma.done.wait (!%p1841_p2), %s1398_s29, 64  }
 0x7cc   : > { %1998 = vsyncadd (!%p1841_p2), %s1398_s29, 4294967232  ;;  %p14_p3 = scmp.ge.s32.totalorder %s2070_s21, 4   ;;  %s2465_s15 = smov %s2005_s16 }
 0x7cd   : > { %s2466_s16 = smov %s2009_s17  ;;  %s2467_s17 = smov %s2081_s24 }
 0x7ce   : > { %s2468_s18 = smov %s2070_s21  ;;  %16 = sbr.rel (!%p14_p3) target bundleno = 3 (0x3), region = 77 }
 0x7d5   :  { %1403 = vsyncpa [#allocation3], 1 }
 0x7d6   :  { %1405 = vsyncpa [#allocation3 + $0x1], 1 }

</bundles_post_ra>
